<compile_context>
chip_gen: v7x
topology: tpu7x:2x2x1
jax: 0.10.0
libtpu: 0.0.40
codegen_flags: <defaults>
</compile_context>

<pallas_src>
import jax
import jax.numpy as jnp
from jax.experimental import pallas as pl
from jax.experimental.pallas import tpu as pltpu


def _round_up(a, m):
    return (a + m - 1) // m * m


def classifier_kernel(x_ref, w1_ref, b1_ref, w2_ref, b2_ref, o_ref):
    # Linear(512 -> 128): cast x to bf16 in-kernel (no wrapper pass over x),
    # f32 accumulation on the MXU.
    x = x_ref[...].astype(w1_ref.dtype)
    h = jnp.dot(x, w1_ref[...], preferred_element_type=jnp.float32)
    h = jnp.maximum(h + b1_ref[...], 0.0)  # bias + ReLU (VPU)
    # Dropout(0.5) -> identity at inference time.
    # TODO(synk): training-mode dropout would need pltpu.prng_seed /
    #             pltpu.prng_random_bits masking plus 1/(1-p)=2.0 scaling.
    # Linear(128 -> num_classes): cast hidden back to bf16 for the MXU.
    out = jnp.dot(h.astype(w2_ref.dtype), w2_ref[...],
                  preferred_element_type=jnp.float32)
    o_ref[...] = (out + b2_ref[...]).astype(o_ref.dtype)


def classifier_forward(x, w1, b1, w2, b2, *, block_b=None):
    """Forward of Linear(512,128) -> ReLU -> Dropout(id) -> Linear(128, NC).

    w1: [512, 128], w2: [128, NC] ([in, out] layout), b1: [128], b2: [NC].
    """
    B, in_features = x.shape
    hidden = w1.shape[1]
    num_classes = w2.shape[1]

    # Batch tile: large enough to amortize the ~0.35 us per-grid-step overhead
    # (the kernel is HBM-bound, not MXU-bound), small enough that the
    # double-buffered f32 x tile stays well under the 32 MiB scoped-VMEM limit,
    # and capped near B/2 so mid-sized batches still yield >= 2 tiles for the
    # two v7x TensorCores. Multiple of 16 for sublane packing.
    if block_b is None:
        if B > 16:
            block_b = min(2048, _round_up(pl.cdiv(B, 2), 16))
        else:
            block_b = _round_up(max(B, 1), 16)
    block_b = max(16, _round_up(block_b, 16))
    grid = (pl.cdiv(B, block_b),)  # boundary block masked by Pallas; no pad

    compute_dtype = jnp.bfloat16
    # Weights/biases are tiny; one-time cast/reshape is negligible. x stays
    # in its native dtype and is cast inside the kernel.
    w1_c = w1.astype(compute_dtype)
    w2_c = w2.astype(compute_dtype)
    b1_c = b1.reshape(1, hidden).astype(jnp.float32)
    b2_c = b2.reshape(1, num_classes).astype(jnp.float32)

    out_dtype = x.dtype
    out_itemsize = jnp.dtype(out_dtype).itemsize
    cost = pl.CostEstimate(
        flops=2 * B * in_features * hidden + 2 * B * hidden * num_classes,
        transcendentals=0,
        bytes_accessed=(B * in_features * jnp.dtype(x.dtype).itemsize
                        + w1_c.size * 2 + w2_c.size * 2
                        + b1_c.size * 4 + b2_c.size * 4
                        + B * num_classes * out_itemsize),
    )

    return pl.pallas_call(
        classifier_kernel,
        out_shape=jax.ShapeDtypeStruct((B, num_classes), out_dtype),
        grid_spec=pltpu.PrefetchScalarGridSpec(
            num_scalar_prefetch=0,
            grid=grid,
            in_specs=[
                # x: batch-tiled, double-buffered by the pipeline (native dtype).
                pl.BlockSpec((block_b, in_features), lambda i: (i, 0)),
                # Weights / biases: constant block index -> VMEM-resident.
                pl.BlockSpec((in_features, hidden), lambda i: (0, 0)),
                pl.BlockSpec((1, hidden), lambda i: (0, 0)),
                pl.BlockSpec((hidden, num_classes), lambda i: (0, 0)),
                pl.BlockSpec((1, num_classes), lambda i: (0, 0)),
            ],
            # True (block_b, num_classes) output tile: full-array last dim,
            # no 128-padded class columns, no wrapper slice copy.
            out_specs=pl.BlockSpec((block_b, num_classes), lambda i: (i, 0)),
        ),
        compiler_params=pltpu.CompilerParams(
            # Independent batch tiles -> shard across v7x's 2 TensorCores.
            dimension_semantics=("parallel",),
            vmem_limit_bytes=32 * 1024 * 1024,
        ),
        cost_estimate=cost,
    )(x, w1_c, b1_c, w2_c, b2_c)


if __name__ == "__main__":
    # Small, deterministic shapes consistent with the module's forward:
    # x: [batch, 512], hidden 128, num_classes=16. Batch chosen so the default
    # tiling gives grid > 1 plus a masked boundary block (B not a multiple of
    # block_b), exercising both code paths.
    B = 200
    IN = 512
    HID = 128
    NUM_CLASSES = 16

    key = jax.random.PRNGKey(0)
    k_x, k_w1, k_b1, k_w2, k_b2 = jax.random.split(key, 5)

    x = jax.random.normal(k_x, (B, IN), dtype=jnp.float32)
    # Deterministic parameter init (synthetic, not a checkpoint load).
    w1 = jax.random.normal(k_w1, (IN, HID), dtype=jnp.float32) * 0.02
    b1 = jax.random.normal(k_b1, (HID,), dtype=jnp.float32) * 0.01
    w2 = jax.random.normal(k_w2, (HID, NUM_CLASSES), dtype=jnp.float32) * 0.02
    b2 = jax.random.normal(k_b2, (NUM_CLASSES,), dtype=jnp.float32) * 0.01

    out = classifier_forward(x, w1, b1, w2, b2)
    jax.block_until_ready(out)

    # Reference with the same bf16 operand quantization / f32 accumulation
    # (inference-mode dropout = identity). bf16 operands are an intentional
    # precision choice (~1e-2 relative on logits vs pure f32).
    def ref_fn(x, w1, b1, w2, b2):
        q = lambda a: a.astype(jnp.bfloat16).astype(jnp.float32)
        h = jnp.maximum(q(x) @ q(w1) + b1[None, :], 0.0)
        return q(h) @ q(w2) + b2[None, :]

    ref = ref_fn(x, w1, b1, w2, b2)
    assert out.shape == (B, NUM_CLASSES)
    assert jnp.allclose(out, ref, atol=5e-3, rtol=5e-3), float(
        jnp.max(jnp.abs(out - ref)))

    print("KERNEL_OK")
</pallas_src>

<mosaic_0001>
module attributes {stable_mosaic.version = 11 : i64} {
  func.func @classifier_kernel(%arg0: i32, %arg1: memref<112x512xf32, #tpu.memory_space<vmem>>, %arg2: memref<512x128xbf16, #tpu.memory_space<vmem>>, %arg3: memref<1x128xf32, #tpu.memory_space<vmem>>, %arg4: memref<128x16xbf16, #tpu.memory_space<vmem>>, %arg5: memref<1x16xf32, #tpu.memory_space<vmem>>, %arg6: memref<112x16xf32, #tpu.memory_space<vmem>>) attributes {dimension_semantics = [#tpu.dimension_semantics<parallel>], iteration_bounds = array<i64: 2>, scalar_prefetch = 0 : i64, scratch_operands = 0 : i64, tpu.core_type = #tpu.core_type<tc>, window_params = [{transform_indices = @transform_0, window_bounds = array<i64: 112, 512>}, {pipeline_mode = #tpu.pipeline_mode<synchronous>, transform_indices = @transform_1, window_bounds = array<i64: 512, 128>}, {pipeline_mode = #tpu.pipeline_mode<synchronous>, transform_indices = @transform_2, window_bounds = array<i64: 1, 128>}, {pipeline_mode = #tpu.pipeline_mode<synchronous>, transform_indices = @transform_3, window_bounds = array<i64: 128, 16>}, {pipeline_mode = #tpu.pipeline_mode<synchronous>, transform_indices = @transform_4, window_bounds = array<i64: 1, 16>}, {transform_indices = @transform_5, window_bounds = array<i64: 112, 16>}]} {
    %c0 = arith.constant 0 : index
    %c0_0 = arith.constant 0 : index
    %0 = vector.load %arg1[%c0, %c0_0] : memref<112x512xf32, #tpu.memory_space<vmem>>, vector<112x512xf32>
    %1 = arith.truncf %0 : vector<112x512xf32> to vector<112x512xbf16>
    %c0_1 = arith.constant 0 : index
    %c0_2 = arith.constant 0 : index
    %2 = vector.load %arg2[%c0_1, %c0_2] : memref<512x128xbf16, #tpu.memory_space<vmem>>, vector<512x128xbf16>
    %cst = arith.constant dense<0.000000e+00> : vector<112x128xf32>
    %3 = tpu.matmul %1, %2, %cst {dimension_numbers = #tpu.dot_dimension_numbers<[1], [0], [0], [1], [0, 0, 1, 1], [], []>} : vector<112x512xbf16>, vector<512x128xbf16>, vector<112x128xf32> -> vector<112x128xf32>
    %c0_3 = arith.constant 0 : index
    %c0_4 = arith.constant 0 : index
    %4 = vector.load %arg3[%c0_3, %c0_4] : memref<1x128xf32, #tpu.memory_space<vmem>>, vector<1x128xf32>
    %5 = vector.broadcast %4 : vector<1x128xf32> to vector<112x128xf32>
    %6 = arith.addf %3, %5 : vector<112x128xf32>
    %cst_5 = arith.constant 0.000000e+00 : f32
    %7 = vector.broadcast %cst_5 : f32 to vector<112x128xf32>
    %8 = arith.maximumf %6, %7 : vector<112x128xf32>
    %9 = arith.truncf %8 : vector<112x128xf32> to vector<112x128xbf16>
    %c0_6 = arith.constant 0 : index
    %c0_7 = arith.constant 0 : index
    %10 = vector.load %arg4[%c0_6, %c0_7] : memref<128x16xbf16, #tpu.memory_space<vmem>>, vector<128x16xbf16>
    %cst_8 = arith.constant dense<0.000000e+00> : vector<112x16xf32>
    %11 = tpu.matmul %9, %10, %cst_8 {dimension_numbers = #tpu.dot_dimension_numbers<[1], [0], [0], [1], [0, 0, 1, 1], [], []>} : vector<112x128xbf16>, vector<128x16xbf16>, vector<112x16xf32> -> vector<112x16xf32>
    %c0_9 = arith.constant 0 : index
    %c0_10 = arith.constant 0 : index
    %12 = vector.load %arg5[%c0_9, %c0_10] : memref<1x16xf32, #tpu.memory_space<vmem>>, vector<1x16xf32>
    %13 = vector.broadcast %12 : vector<1x16xf32> to vector<112x16xf32>
    %14 = arith.addf %11, %13 : vector<112x16xf32>
    %c0_11 = arith.constant 0 : index
    %c0_12 = arith.constant 0 : index
    %15 = vector.load %arg6[%c0_11, %c0_12] : memref<112x16xf32, #tpu.memory_space<vmem>>, vector<112x16xf32>
    tpu.vector_store %arg6[%c0_11, %c0_12], %14 {strides = array<i32>} : memref<112x16xf32, #tpu.memory_space<vmem>>, vector<112x16xf32>,
    return
  }
  func.func @transform_0(%arg0: i32) -> (i32, i32) {
    %c0_i32 = arith.constant 0 : i32
    %c0_i32_0 = arith.constant 0 : i32
    return %arg0, %c0_i32 : i32, i32
  }
  func.func @transform_1(%arg0: i32) -> (i32, i32) {
    %c0_i32 = arith.constant 0 : i32
    %c0_i32_0 = arith.constant 0 : i32
    %c0_i32_1 = arith.constant 0 : i32
    return %c0_i32, %c0_i32_0 : i32, i32
  }
  func.func @transform_2(%arg0: i32) -> (i32, i32) {
    %c0_i32 = arith.constant 0 : i32
    %c0_i32_0 = arith.constant 0 : i32
    %c0_i32_1 = arith.constant 0 : i32
    return %c0_i32, %c0_i32_0 : i32, i32
  }
  func.func @transform_3(%arg0: i32) -> (i32, i32) {
    %c0_i32 = arith.constant 0 : i32
    %c0_i32_0 = arith.constant 0 : i32
    %c0_i32_1 = arith.constant 0 : i32
    return %c0_i32, %c0_i32_0 : i32, i32
  }
  func.func @transform_4(%arg0: i32) -> (i32, i32) {
    %c0_i32 = arith.constant 0 : i32
    %c0_i32_0 = arith.constant 0 : i32
    %c0_i32_1 = arith.constant 0 : i32
    return %c0_i32, %c0_i32_0 : i32, i32
  }
  func.func @transform_5(%arg0: i32) -> (i32, i32) {
    %c0_i32 = arith.constant 0 : i32
    %c0_i32_0 = arith.constant 0 : i32
    return %arg0, %c0_i32 : i32, i32
  }
}

</mosaic_0001>

<bundles_post_ra>
// kernel: tpu_custom_call.1
= control target key start
LH: loop header
LB: loop body
LE: loop exit
PB: predicated region body
PF: predicated region fallthrough
CT: control target
= control target key end

     0   :  { %10 = vsyncpa [#allocation3], 0  ;;  %s2317_s0 = inlined_call_operand.hbm [shape: f32[200,512], index: 0, kind: input, shape index: {}]   ;;  %s2318_s1 = inlined_call_operand.hbm [shape: bf16[512,128], index: 1, kind: input, shape index: {}]   ;;  %s2319_s2 = inlined_call_operand.vmem [shape: f32[1,128], index: 2, kind: input, shape index: {}]   ;;  %s2320_s3 = inlined_call_operand.vmem [shape: bf16[128,16], index: 3, kind: input, shape index: {}]   ;;  %s2321_s4 = inlined_call_operand.vmem [shape: f32[1,16], index: 4, kind: input, shape index: {}]   ;;  %s2322_s5 = inlined_call_operand.vmem [shape: f32[200,16], index: 5, kind: output, shape index: {}]  }
   0x1   :  { %12 = vsyncpa [#allocation3 + $0x1], 0 }
   0x2   :  { %13 = vsyncpa [#allocation5], 0  ;;  %s1908_s18 = smov 0   ;;  %s1910_s19 = smov 0  }
   0x3   :  { %s1912_s20 = smov 0   ;;  %s1914_s21 = smov 0  }
   0x4 LB: > { %s1927_s22 = sadd.s32 4294967295, %s1836_s21   ;;  %s1930_s23 = sadd.s32 1, %s1836_s21   ;;  %s1836_s21 = sphi %s1914_s21, %s2343_s21   ;;  %s1832_s20 = sphi %s1912_s20, %s2342_s20   ;;  %s1828_s19 = sphi %s1910_s19, %s2341_s19   ;;  %s1824_s18 = sphi %s1908_s18, %s2340_s18  }
   0x5   : > { %s23_s24 = ssub.s32 %s1836_s21, %s1930_s23  ;;  %s26_s25 = sadd.s32 1, %s1832_s20 }
   0x6   : > { %p24_p0 = scmp.eq.s32.totalorder %s23_s24, 0  ;;  %p33_p1 = scmp.ne.s32.totalorder %s1832_s20, %s1828_s19 }
   0x7   : > { %p34_p2 = scmp.eq.s32.totalorder %s1836_s21, 0  ;;  %p39_p3 = scmp.ne.s32.totalorder %s1828_s19, %s1824_s18 }
   0x8   : > { %s1940_s26 = scalar_select %p24_p0, %s1832_s20, %s26_s25  }
   0x9   : > { %p1942_p4 = por %p34_p2, %p33_p1  ;;  %p2323_p5 = scmp.eq.s32.totalorder %s1927_s22, 0 }
   0xa   : > { %p147_p6 = scmp.eq.s32.totalorder %s1927_s22, 1  ;;  %p1286_p7 = scmp.ge.s32.totalorder %s1836_s21, 1 }
   0xb   : > { %s2326_s27 = scalar_select %p1942_p4, 1, 0 }
   0xc   : > { %p1951_p8 = por %p2323_p5, %p39_p3  ;;  %p160_p9 = scmp.lt.s32.totalorder %s1836_s21, 3 }
   0xd   : > { %p1956_p10 = por %p147_p6, %p33_p1  ;;  %s1870_s6 = smov [#allocation4]  }
   0xe   : > { %s2327_s28 = scalar_select %p1951_p8, 1, 0 }
   0xf   : > { %s2328_s29 = scalar_select %p1956_p10, 1, 0 }
  0x10   : > { %p1960_p11 = pnand %p1286_p7, %p160_p9  ;;  %s172_s7 = sshll.u32 %s1870_s6, 4  ;;  %s173_s7 = int_to_ptr.vmem [resolvable:$true] %s172_s7 }
  0x11   : > { %s1710_s11 = scalar_lea.hbm %s2318_s1, 4096 }
  0x12   : > { %s2329_s30 = scalar_select %p1960_p11, 1, 0 }
  0x13   : > { %p1556_p12 = pneg %p1960_p11  ;;  %p1711_p0 = scmp.ne.s32.totalorder %s2318_s1, %s1710_s11 }
  0x14   : > { %p1717_p6 = scmp.lt.u32.totalorder %s1710_s11, %s2318_s1 }
  0x15   : > { %p1968_p13 = pnand %p1556_p12, %p2323_p5 }
  0x17   : > { %p1712_p1 = pneg %p1968_p13 }
  0x19   : > { %p1713_p2 = pnand %p1712_p1, %p1711_p0 }
  0x1b   : > { %p1714_p3 = pneg %p1713_p2 }
  0x1d   : > { %p1719_p7 = pnand %p1717_p6, %p1714_p3 }
  0x1f   : > { %1722 = shalt.err (!%p1719_p7)
}
  0x20   : > { %s1723_s16 = scalar_lea.vmem %s173_s7, 4096  ;;  %p1731_p10 = scmp.lt.s32.totalorder %s173_s7, %s173_s7 }
  0x21   : > { %p1724_p9 = scmp.ne.s32.totalorder %s173_s7, %s1723_s16  ;;  %p1732_p8 = scmp.lt.s32.totalorder %s1723_s16, %s1723_s16 }
  0x23   : > { %p1726_p12 = pnand %p1724_p9, %p1712_p1  ;;  %p1733_p11 = por %p1732_p8, %p1731_p10 }
  0x25   : > { %p1727_p5 = pneg %p1726_p12 }
  0x27   : > { %p1734_p4 = pnand %p1733_p11, %p1727_p5 }
  0x29   : > { %1737 = shalt.err (!%p1734_p4)
}
  0x2a   : > { %s1871_s17 = smov 64   ;;  %s1872_s18 = smov 4  }
  0x2b   : > { %1559 = dma.hbm_to_vmem [thread:$0]  (!%p1968_p13), %s2318_s1, 4096, %s173_s7, [#allocation5], %s1871_s17, %s1871_s17, %s1872_s18  }
  0x2c   : > { %p1288_p0 = scmp.ge.s32.totalorder %s1836_s21, 2 }
  0x2d   : > { %p2331_p2 = scmp.ne.s32.totalorder (!%p1288_p0), %s2326_s27, 0 }
  0x2e   : > { %191 = sbr.rel (%p1288_p0) target bundleno = 88 (0x58), region = 32 }
  0x35   : > { %194 = sbr.rel (!%p2331_p2) target bundleno = 88 (0x58), region = 36  ;;  %s195_s6 = sand.u32 (%p2331_p2), 1, %s1832_s20  }
  0x36   : > { %s200_s9 = smul.u32 (%p2331_p2), 14, %s1836_s21  ;;  %s1996_s13 = scalar_lea.sflag (%p2331_p2), [#allocation3], %s195_s6 }
  0x37   : > { %s1548_s10 = smul.u32 (%p2331_p2), 448, %s195_s6 }
  0x38   : > { %s201_s11 = ssub.s32 (%p2331_p2), 25, %s200_s9 }
  0x39   : > { %p202_p4 = scmp.lt.s32.totalorder (%p2331_p2), %s201_s11, 14  ;;  %s199_s7 = scalar_lea.vmem (%p2331_p2), [#allocation2], %s1548_s10 }
  0x3c   : > { %s2345_s11 = smov (!%p202_p4, %s201_s11), 14 }
  0x3d   : > { %s1993_s12 = sshll.u32 %s2345_s11, 9 }
  0x3e   : > { %s207_s8 = ssub.s32 7168, %s1993_s12 }
  0x3f   : > { %208 = vsyncadd %s1996_s13, %s207_s8  ;;  %p1291_p5 = scmp.ne.s32.totalorder %s1993_s12, 0  ;;  %s1356_s27 = smul.u32 7168, %s1836_s21 }
  0x40   : > { %s214_s14 = sshll.u32 %s199_s7, 4  ;;  %s1742_s21 = scalar_lea.hbm %s2317_s0, 12800  ;;  %s2006_s14 = int_to_ptr.vmem [resolvable:$true] %s214_s14 }
  0x41   : > { %s2004_s17 = scalar_lea.hbm %s2317_s0, %s1356_s27 }
  0x42   : > { %s1738_s18 = scalar_lea.hbm %s2004_s17, %s1993_s12  ;;  %p1743_p13 = scmp.lt.u32.totalorder %s2004_s17, %s2317_s0 }
  0x43   : > { %p1739_p8 = scmp.ne.s32.totalorder %s2004_s17, %s1738_s18  ;;  %p1744_p1 = scmp.lt.u32.totalorder %s1742_s21, %s1738_s18 }
  0x44   : > { %p1746_p6 = scmp.lt.u32.totalorder %s1738_s18, %s2004_s17 }
  0x45   : > { %p1740_p10 = pnand %p1739_p8, %p1291_p5  ;;  %p1745_p3 = por %p1744_p1, %p1743_p13 }
  0x47   : > { %p1741_p11 = pneg %p1740_p10  ;;  %p1747_p7 = por %p1746_p6, %p1745_p3 }
  0x49   : > { %p1748_p9 = pnand %p1747_p7, %p1741_p11 }
  0x4b   : > { %1751 = shalt.err (!%p1748_p9)
}
  0x4c   : > { %s1752_s10 = scalar_lea.vmem %s2006_s14, %s1993_s12  ;;  %s1873_s11 = smov [#allocation2]  }
  0x4d   : > { %p1753_p12 = scmp.ne.s32.totalorder %s2006_s14, %s1752_s10  ;;  %s1756_s8 = sshll.u32 %s1873_s11, 4  ;;  %s1757_s8 = int_to_ptr.vmem [resolvable:$false] %s1756_s8 }
  0x4e   : > { %s1758_s7 = scalar_lea.vmem %s1757_s8, 14336  ;;  %p1759_p4 = scmp.lt.s32.totalorder %s2006_s14, %s1757_s8 }
  0x4f   : > { %p1754_p0 = pnand %p1753_p12, %p1291_p5  ;;  %p1760_p8 = scmp.lt.s32.totalorder %s1758_s7, %s1752_s10 }
  0x51   : > { %p1755_p2 = pneg %p1754_p0  ;;  %p1761_p10 = por %p1760_p8, %p1759_p4 }
  0x53   : > { %p1762_p13 = pnand %p1761_p10, %p1755_p2 }
  0x55   : > { %1765 = shalt.err (!%p1762_p13)
}
  0x56   : > { %s1874_s27 = smov 512   ;;  %s1875_s15 = smov 32  }
  0x57   : > { %220 = dma.hbm_to_vmem [thread:$0]  (%p1291_p5), %s2004_s17, %s1993_s12, %s2006_s14, %s1996_s13, %s1874_s27, %s1874_s27, %s1875_s15  }
  0x58 PF: > { %p2332_p11 = scmp.ne.s32.totalorder %s2329_s30, 0 }
  0x59   : > { %s2036_s16 = sand.u32 (!%p2332_p11), 1, %s1828_s19   ;;  %p2333_p1 = scmp.ne.s32.totalorder (!%p2332_p11), %s2327_s28, 0 }
  0x5a   : > { %226 = sbr.rel (%p2332_p11) target bundleno = 715 (0x2cb), region = 40  ;;  %s229_s24 = scalar_lea.sflag (!%p2332_p11), [#allocation3], %s2036_s16 }
  0x5b   : > { %s1549_s18 = smul.u32 (!%p2332_p11), 448, %s2036_s16 }
  0x5d   : > { %s2040_s25 = scalar_lea.vmem (!%p2332_p11), [#allocation2], %s1549_s18 }
  0x61   : > { %1815 = dma.done.wait (%p2333_p1), %s229_s24, 7168  }
  0x62   : > { %1817 = vsyncadd (%p2333_p1), %s229_s24, 4294960128  ;;  %p2334_p5 = scmp.eq.s32.totalorder %s1927_s22, 0 }
  0x64   : > { %1819 = dma.done.wait (%p2334_p5), [#allocation5], 4096   ;;  %p2335_p3 = pmov %p2334_p5 }
  0x65   : > { %v1666_v0 = vld [vmem:[#allocation4 + $0x40] sm:$0xff]   ;;  %v1668_v2 = vld [vmem:[#allocation4 + $0x48] sm:$0xff]   ;;  %v1670_v4 = vld [vmem:[#allocation4 + $0x50] sm:$0xff]   ;;  %vm1877_vm0 = vmmov 0   ;;  %s1550_s28 = smul.u32 112, %s2036_s16  ;;  %vm980_vm1 = vcmask 130048  }
  0x66   : > { %1821 = vsyncadd (%p2335_p3), [#allocation5], 4294963200  ;;  %v1667_v1 = vld [vmem:[#allocation4] sm:$0xff]   ;;  %1532 = vmatprep.subr.bf16.mxu1 %v1666_v0  ;;  %1357 = vmatprep.subr.bf16.mxu0 %v1666_v0  ;;  %v1669_v3 = vld [vmem:[#allocation4 + $0x8] sm:$0xff]   ;;  %p2336_p6 = scmp.ne.s32.totalorder %s2328_s29, 0 }
  0x67   : > { %1540 = vmatpush3.bf16.msra.mxu1 %v1667_v1  ;;  %1358 = vmatpush3.bf16.msra.mxu0 %v1667_v1  ;;  %v1671_v5 = vld [vmem:[#allocation4 + $0x10] sm:$0xff]   ;;  %v1672_v6 = vld [vmem:[#allocation4 + $0x58] sm:$0xff]   ;;  %v1674_v8 = vld [vmem:[#allocation4 + $0x60] sm:$0xff]   ;;  %s2193_s13 = scalar_lea.vmem [#allocation6], %s1550_s28   ;;  %s1002_s16 = smul.u32 (%p2336_p6), 14, %s1927_s22 }
  0x68   : > { %1533 = vmatprep.subr.bf16.mxu1 %v1668_v2  ;;  %1359 = vmatprep.subr.bf16.mxu0 %v1668_v2  ;;  %v1673_v7 = vld [vmem:[#allocation4 + $0x18] sm:$0xff]   ;;  %v1675_v9 = vld [vmem:[#allocation4 + $0x20] sm:$0xff]   ;;  %v1676_v10 = vld [vmem:[#allocation4 + $0x68] sm:$0xff]   ;;  %s1355_s14 = smul.u32 (%p2336_p6), 112, %s1927_s22 }
  0x69   : > { %v307_v11 = vld [vmem:[%s2040_s25 + $0x108] sm:$0xff]  ;;  %v1678_v15 = vld [vmem:[#allocation4 + $0x70] sm:$0xff]   ;;  %v1680_v17 = vld [vmem:[#allocation4 + $0x78] sm:$0xff]   ;;  %s1003_s17 = ssub.s32 (%p2336_p6), 25, %s1002_s16 }
  0x6a   : > { %v311_v12 = vld [vmem:[%s2040_s25 + $0x128] sm:$0xff]  ;;  %v1679_v16 = vld [vmem:[#allocation4 + $0x30] sm:$0xff]   ;;  %v1681_v18 = vld [vmem:[#allocation4 + $0x38] sm:$0xff]   ;;  %p1004_p7 = scmp.lt.s32.totalorder (%p2336_p6), %s1003_s17, 14  ;;  %s2230_s9 = scalar_lea.vmem (%p2336_p6), %s2322_s5, %s1355_s14  }
  0x6b   : > { %1541 = vmatpush3.bf16.msra.mxu1 %v1669_v3  ;;  %1360 = vmatpush3.bf16.msra.mxu0 %v1669_v3  ;;  %v347_v13 = vpack.c.bf16 %v311_v12, %v307_v11  ;;  %v1677_v14 = vld [vmem:[#allocation4 + $0x28] sm:$0xff]   ;;  %v306_v19 = vld [vmem:[%s2040_s25 + $0x100] sm:$0xff]  ;;  %v1686_v31 = vld [vmem:[#allocation4 + $0xd0] sm:$0xff]  }
  0x6c   : > { %1534 = vmatprep.subr.bf16.mxu1 %v1670_v4  ;;  %1361 = vmatprep.subr.bf16.mxu0 %v1670_v4  ;;  %v310_v20 = vld [vmem:[%s2040_s25 + $0x120] sm:$0xff]  ;;  %v315_v22 = vld [vmem:[%s2040_s25 + $0x148] sm:$0xff]  ;;  %v1687_v40 = vld [vmem:[#allocation4 + $0x90] sm:$0xff]  }
  0x6d   : > { %685 = vmatprep.mubr.bf16.mxu1 %v347_v13  ;;  %v1682_v21 = vld [vmem:[#allocation4 + $0xc0] sm:$0xff]   ;;  %v319_v23 = vld [vmem:[%s2040_s25 + $0x168] sm:$0xff]  ;;  %v346_v24 = vpack.c.bf16 %v310_v20, %v306_v19  ;;  %v1688_v47 = vld [vmem:[#allocation4 + $0xd8] sm:$0xff]  }
  0x6e   : > { %v1683_v25 = vld [vmem:[#allocation4 + $0x80] sm:$0xff]   ;;  %v351_v26 = vpack.c.bf16 %v319_v23, %v315_v22  ;;  %v1684_v27 = vld [vmem:[#allocation4 + $0xc8] sm:$0xff]   ;;  %v1689_v52 = vld [vmem:[#allocation4 + $0x98] sm:$0xff]  }
  0x6f   : > { %1542 = vmatpush3.bf16.msra.mxu1 %v1671_v5  ;;  %1362 = vmatpush3.bf16.msra.mxu0 %v1671_v5  ;;  %v1685_v28 = vld [vmem:[#allocation4 + $0x88] sm:$0xff]   ;;  %v314_v29 = vld [vmem:[%s2040_s25 + $0x140] sm:$0xff]  ;;  %v277_v57 = vld [vmem:[%s2040_s25 + $0x18] sm:$0xff] }
  0x70   : > { %1535 = vmatprep.subr.bf16.mxu1 %v1672_v6  ;;  %1363 = vmatprep.subr.bf16.mxu0 %v1672_v6  ;;  %v318_v30 = vld [vmem:[%s2040_s25 + $0x160] sm:$0xff]  ;;  %v323_v32 = vld [vmem:[%s2040_s25 + $0x188] sm:$0xff]  ;;  %v281_v58 = vld [vmem:[%s2040_s25 + $0x38] sm:$0xff] }
  0x71   : > { %v275_v33 = vld [vmem:[%s2040_s25 + $0x8] sm:$0xff]  ;;  %v274_v35 = vld [vmem:[%s2040_s25] sm:$0xff]  ;;  %v350_v41 = vpack.c.bf16 %v318_v30, %v314_v29  ;;  %v333_v61 = vpack.c.bf16 %v281_v58, %v277_v57  ;;  %v1694_v4 = vld [vmem:[#allocation4 + $0xf0] sm:$0xff]  }
  0x72   : > { %v279_v34 = vld [vmem:[%s2040_s25 + $0x28] sm:$0xff]  ;;  %v278_v37 = vld [vmem:[%s2040_s25 + $0x20] sm:$0xff]  ;;  %v1697_v12 = vld [vmem:[#allocation4 + $0xb8] sm:$0xff]  }
  0x73   : > { %1543 = vmatpush3.bf16.msra.mxu1 %v1673_v7  ;;  %1364 = vmatpush3.bf16.msra.mxu0 %v1673_v7  ;;  %v331_v36 = vpack.c.bf16 %v279_v34, %v275_v33  ;;  %v327_v38 = vld [vmem:[%s2040_s25 + $0x1a8] sm:$0xff]  ;;  %v330_v39 = vpack.c.bf16 %v278_v37, %v274_v35  ;;  %v282_v45 = vld [vmem:[%s2040_s25 + $0x40] sm:$0xff]  ;;  %v1695_v7 = vld [vmem:[#allocation4 + $0xb0] sm:$0xff]  }
  0x74   : > { %1536 = vmatprep.subr.bf16.mxu1 %v1674_v8  ;;  %1365 = vmatprep.subr.bf16.mxu0 %v1674_v8  ;;  %v283_v42 = vld [vmem:[%s2040_s25 + $0x48] sm:$0xff]  ;;  %v355_v43 = vpack.c.bf16 %v327_v38, %v323_v32  ;;  %v286_v46 = vld [vmem:[%s2040_s25 + $0x60] sm:$0xff]  ;;  %v276_v13 = vld [vmem:[%s2040_s25 + $0x10] sm:$0xff] }
  0x75   : > { %653 = vmatprep.mubr.bf16.mxu0 %v331_v36  ;;  %v287_v44 = vld [vmem:[%s2040_s25 + $0x68] sm:$0xff]  ;;  %v334_v51 = vpack.c.bf16 %v286_v46, %v282_v45  ;;  %v322_v53 = vld [vmem:[%s2040_s25 + $0x180] sm:$0xff]  ;;  %v284_v19 = vld [vmem:[%s2040_s25 + $0x50] sm:$0xff] }
  0x76   : > { %v335_v48 = vpack.c.bf16 %v287_v44, %v283_v42  ;;  %v291_v49 = vld [vmem:[%s2040_s25 + $0x88] sm:$0xff]  ;;  %v326_v54 = vld [vmem:[%s2040_s25 + $0x1a0] sm:$0xff]  ;;  %v288_v20 = vld [vmem:[%s2040_s25 + $0x70] sm:$0xff] }
  0x77   : > { %1544 = vmatpush3.bf16.msra.mxu1 %v1675_v9  ;;  %1366 = vmatpush3.bf16.msra.mxu0 %v1675_v9  ;;  %v295_v50 = vld [vmem:[%s2040_s25 + $0xa8] sm:$0xff]  ;;  %v1690_v56 = vld [vmem:[#allocation4 + $0xe0] sm:$0xff]   ;;  %v354_v59 = vpack.c.bf16 %v326_v54, %v322_v53  ;;  %v297_v22 = vld [vmem:[%s2040_s25 + $0xb8] sm:$0xff]  ;;  %v336_v23 = vpack.c.bf16 %v288_v20, %v284_v19  ;;  %v1876_v53 = vmov 0.0  }
  0x78   : > { %1537 = vmatprep.subr.bf16.mxu1 %v1676_v10  ;;  %1367 = vmatprep.subr.bf16.mxu0 %v1676_v10  ;;  %v339_v55 = vpack.c.bf16 %v295_v50, %v291_v49  ;;  %v1691_v60 = vld [vmem:[#allocation4 + $0xa0] sm:$0xff]   ;;  %v1692_v0 = vld [vmem:[#allocation4 + $0xe8] sm:$0xff]   ;;  %v1696_v10 = vld [vmem:[#allocation4 + $0xf8] sm:$0xff]  }
  0x79   : > { %v290_v62 = vld [vmem:[%s2040_s25 + $0x80] sm:$0xff]  ;;  %v299_v1 = vld [vmem:[%s2040_s25 + $0xc8] sm:$0xff]  ;;  %v304_v32 = vld [vmem:[%s2040_s25 + $0xf0] sm:$0xff] }
  0x7a   : > { %v294_v63 = vld [vmem:[%s2040_s25 + $0xa0] sm:$0xff]  ;;  %v303_v2 = vld [vmem:[%s2040_s25 + $0xe8] sm:$0xff]  ;;  %v309_v33 = vld [vmem:[%s2040_s25 + $0x118] sm:$0xff] }
  0x7b   : > { %1545 = vmatpush3.bf16.msra.mxu1 %v1677_v14  ;;  %1368 = vmatpush3.bf16.msra.mxu0 %v1677_v14  ;;  %v1693_v3 = vld [vmem:[#allocation4 + $0xa8] sm:$0xff]   ;;  %v338_v5 = vpack.c.bf16 %v294_v63, %v290_v62  ;;  %v343_v6 = vpack.c.bf16 %v303_v2, %v299_v1  ;;  %v298_v8 = vld [vmem:[%s2040_s25 + $0xc0] sm:$0xff]  ;;  %v280_v14 = vld [vmem:[%s2040_s25 + $0x30] sm:$0xff] }
  0x7c   : > { %1538 = vmatprep.subr.bf16.mxu1 %v1678_v15  ;;  %1369 = vmatprep.subr.bf16.mxu0 %v1678_v15  ;;  %v302_v9 = vld [vmem:[%s2040_s25 + $0xe0] sm:$0xff]  ;;  %v285_v15 = vld [vmem:[%s2040_s25 + $0x58] sm:$0xff]  ;;  %v308_v37 = vld [vmem:[%s2040_s25 + $0x110] sm:$0xff] }
  0x7d   : > { %v342_v11 = vpack.c.bf16 %v302_v9, %v298_v8  ;;  %v313_v34 = vld [vmem:[%s2040_s25 + $0x138] sm:$0xff]  ;;  %v312_v38 = vld [vmem:[%s2040_s25 + $0x130] sm:$0xff]  ;;  %v1699_v54 = vld [vmem:[%s2320_s3 + $0x8] sm:$0xff]  }
  0x7e   : > { %v349_v36 = vpack.c.bf16 %v313_v34, %v309_v33  ;;  %v320_v44 = vld [vmem:[%s2040_s25 + $0x170] sm:$0xff]  ;;  %v325_v45 = vld [vmem:[%s2040_s25 + $0x198] sm:$0xff]  ;;  %v1702_v57 = vld [vmem:[%s2320_s3 + $0x20] sm:$0xff]  }
  0x7f   : > { %1546 = vmatpush3.bf16.msra.mxu1 %v1679_v16  ;;  %1370 = vmatpush3.bf16.msra.mxu0 %v1679_v16  ;;  %v289_v16 = vld [vmem:[%s2040_s25 + $0x78] sm:$0xff]  ;;  %v324_v49 = vld [vmem:[%s2040_s25 + $0x190] sm:$0xff]  ;;  %v1703_v58 = vld [vmem:[%s2320_s3 + $0x28] sm:$0xff]  }
  0x80   : > { %1539 = vmatprep.subr.bf16.mxu1 %v1680_v17  ;;  %1371 = vmatprep.subr.bf16.mxu0 %v1680_v17  ;;  %v332_v17 = vpack.c.bf16 %v280_v14, %v276_v13  ;;  %v329_v46 = vld [vmem:[%s2040_s25 + $0x1b8] sm:$0xff]  ;;  %v328_v50 = vld [vmem:[%s2040_s25 + $0x1b0] sm:$0xff] }
  0x83   : > { %1547 = vmatpush3.bf16.msra.mxu1 %v1681_v18  ;;  %1372 = vmatpush3.bf16.msra.mxu0 %v1681_v18  ;;  %v337_v18 = vpack.c.bf16 %v289_v16, %v285_v15 }
  0x84   : > { %1415 = vmatprep.subr.bf16.mxu1 %v1682_v21  ;;  %v293_v21 = vld [vmem:[%s2040_s25 + $0x98] sm:$0xff]  ;;  %1488 = vmatprep.subr.bf16.mxu0 %v1876_v53 }
  0x86   : > { %686 = vmatmul.mubr.bf16.vlgmr.msra.gmra.mrb[0].mxu1 %v346_v24  ;;  %654 = vmatmul.mubr.bf16.vlgmr.msra.gmra.mrb[0].mxu0 %v330_v39  ;;  %v341_v24 = vpack.c.bf16 %v297_v22, %v293_v21  ;;  %v317_v39 = vld [vmem:[%s2040_s25 + $0x158] sm:$0xff] }
  0x87   : > { %1416 = vmatpush3.bf16.msra.mxu1 %v1683_v25  ;;  %693 = vmatprep.mubr.bf16.mxu1 %v351_v26  ;;  %v292_v25 = vld [vmem:[%s2040_s25 + $0x90] sm:$0xff] }
  0x88   : > { %1417 = vmatprep.subr.bf16.mxu1 %v1684_v27  ;;  %661 = vmatprep.mubr.bf16.mxu0 %v335_v48  ;;  %v296_v26 = vld [vmem:[%s2040_s25 + $0xb0] sm:$0xff]  ;;  %v301_v27 = vld [vmem:[%s2040_s25 + $0xd8] sm:$0xff]  ;;  %v357_v48 = vpack.c.bf16 %v329_v46, %v325_v45 }
  0x89   : > { %v340_v29 = vpack.c.bf16 %v296_v26, %v292_v25 }
  0x8b   : > { %1418 = vmatpush3.bf16.msra.mxu1 %v1685_v28  ;;  %v305_v28 = vld [vmem:[%s2040_s25 + $0xf8] sm:$0xff] }
  0x8c   : > { %1419 = vmatprep.subr.bf16.mxu1 %v1686_v31  ;;  %v345_v30 = vpack.c.bf16 %v305_v28, %v301_v27  ;;  %v300_v31 = vld [vmem:[%s2040_s25 + $0xd0] sm:$0xff] }
  0x8d   : > { %v344_v35 = vpack.c.bf16 %v304_v32, %v300_v31 }
  0x8e   : > { %694 = vmatmul.mubr.bf16.gmra.mrb[4].mxu1 %v350_v41  ;;  %662 = vmatmul.mubr.bf16.gmra.mrb[4].mxu0 %v334_v51  ;;  %v348_v41 = vpack.c.bf16 %v312_v38, %v308_v37  ;;  %v356_v51 = vpack.c.bf16 %v328_v50, %v324_v49  ;;  %v2155_v37 = vld [vmem:[%s2319_s2] ss:$0 sm:$0xff] }
  0x8f   : > { %1420 = vmatpush3.bf16.msra.mxu1 %v1687_v40  ;;  %701 = vmatprep.mubr.bf16.mxu1 %v355_v43  ;;  %v321_v40 = vld [vmem:[%s2040_s25 + $0x178] sm:$0xff]  ;;  %v316_v43 = vld [vmem:[%s2040_s25 + $0x150] sm:$0xff] }
  0x90   : > { %1421 = vmatprep.subr.bf16.mxu1 %v1688_v47  ;;  %669 = vmatprep.mubr.bf16.mxu0 %v339_v55  ;;  %v353_v42 = vpack.c.bf16 %v321_v40, %v317_v39  ;;  %v352_v47 = vpack.c.bf16 %v320_v44, %v316_v43  ;;  %v1700_v55 = vld [vmem:[%s2320_s3 + $0x10] sm:$0xff]  }
  0x93   : > { %1422 = vmatpush3.bf16.msra.mxu1 %v1689_v52  ;;  %v1698_v52 = vld [vmem:[%s2320_s3] sm:$0xff]  }
  0x94   : > { %1423 = vmatprep.subr.bf16.mxu1 %v1690_v56  ;;  %1489 = vmatpush3.bf16.msra.mxu0 %v1698_v52  ;;  %v1701_v56 = vld [vmem:[%s2320_s3 + $0x18] sm:$0xff]  }
  0x95   : > { %1490 = vmatprep.subr.bf16.mxu0 %v1876_v53 }
  0x96   : > { %702 = vmatmul.mubr.bf16.gmra.mrb[8].mxu1 %v354_v59  ;;  %670 = vmatmul.mubr.bf16.gmra.mrb[8].mxu0 %v338_v5  ;;  %v1704_v59 = vld [vmem:[%s2320_s3 + $0x30] sm:$0xff]  }
  0x97   : > { %1424 = vmatpush3.bf16.msra.mxu1 %v1691_v60  ;;  %742 = vmatprep.mubr.bf16.mxu1 %v333_v61  ;;  %v1705_v60 = vld [vmem:[%s2320_s3 + $0x38] sm:$0xff]  }
  0x98   : > { %1425 = vmatprep.subr.bf16.mxu1 %v1692_v0  ;;  %677 = vmatprep.mubr.bf16.mxu0 %v343_v6 }
  0x99   : > { %1491 = vmatpush3.bf16.msra.mxu0 %v1699_v54 }
  0x9a   : > { %1492 = vmatprep.subr.bf16.mxu0 %v1876_v53 }
  0x9b   : > { %1426 = vmatpush3.bf16.msra.mxu1 %v1693_v3 }
  0x9c   : > { %1427 = vmatprep.subr.bf16.mxu1 %v1694_v4 }
  0x9d   : > { %1493 = vmatpush3.bf16.msra.mxu0 %v1700_v55 }
  0x9e   : > { %678 = vmatmul.mubr.bf16.gmra.mrb[12].mxu0 %v342_v11  ;;  %1494 = vmatprep.subr.bf16.mxu0 %v1876_v53 }
  0x9f   : > { %1428 = vmatpush3.bf16.msra.mxu1 %v1695_v7  ;;  %1504 = vmatprep.mubr.msk.bf16.mxu0 %vm1877_vm0, %v1876_v53 }
  0xa0   : > { %1429 = vmatprep.subr.bf16.mxu1 %v1696_v10 }
  0xa1   : > { %1495 = vmatpush3.bf16.msra.mxu0 %v1701_v56 }
  0xa2   : > { %1496 = vmatprep.subr.bf16.mxu0 %v1876_v53 }
  0xa3   : > { %1430 = vmatpush3.bf16.msra.mxu1 %v1697_v12 }
  0xa5   : > { %1497 = vmatpush3.bf16.msra.mxu0 %v1702_v57 }
  0xa6   : > { %743 = vmatmul.mubr.bf16.vlgmr.msra.gmra.mrb[12].mxu1 %v332_v17  ;;  %1498 = vmatprep.subr.bf16.mxu0 %v1876_v53 }
  0xa7   : > { %750 = vmatprep.mubr.bf16.mxu1 %v337_v18 }
  0xa9   : > { %1499 = vmatpush3.bf16.msra.mxu0 %v1703_v58 }
  0xaa   : > { %1500 = vmatprep.subr.bf16.mxu0 %v1876_v53 }
  0xad   : > { %1501 = vmatpush3.bf16.msra.mxu0 %v1704_v59 }
  0xae   : > { %751 = vmatmul.mubr.bf16.gmra.mrb[16].mxu1 %v336_v23  ;;  %1502 = vmatprep.subr.bf16.mxu0 %v1876_v53 }
  0xaf   : > { %758 = vmatprep.mubr.bf16.mxu1 %v341_v24 }
  0xb1   : > { %1503 = vmatpush3.bf16.msra.mxu0 %v1705_v60 }
  0xb6   : > { %759 = vmatmul.mubr.bf16.gmra.mrb[20].mxu1 %v340_v29 }
  0xb7   : > { %766 = vmatprep.mubr.bf16.mxu1 %v345_v30 }
  0xbe   : > { %767 = vmatmul.mubr.bf16.gmra.mrb[24].mxu1 %v344_v35 }
  0xbf   : > { %774 = vmatprep.mubr.bf16.mxu1 %v349_v36 }
  0xc6   : > { %775 = vmatmul.mubr.bf16.gmra.mrb[28].mxu1 %v348_v41 }
  0xc7   : > { %782 = vmatprep.mubr.bf16.mxu1 %v353_v42 }
  0xce   : > { %783 = vmatmul.mubr.bf16.gmra.mrb[32].mxu1 %v352_v47 }
  0xcf   : > { %790 = vmatprep.mubr.bf16.mxu1 %v357_v48 }
  0xd6   : > { %791 = vmatmul.mubr.bf16.gmra.mrb[36].mxu1 %v356_v51 }
 0x159   : > { %v1397_v61 = vpop.f32.mrb[0].mxu1  ;;  %v1373_v3 = vpop.f32.mrb[0].mxu0 }
 0x15a   : > { %v1398_v62 = vpop.f32.mrb[1].mxu1  ;;  %v1374_v4 = vpop.f32.mrb[1].mxu0 }
 0x15b   : > { %v2140_v63 = vadd.f32 %v1398_v62, %v1397_v61  ;;  %v1400_v0 = vpop.f32.mrb[2].mxu1  ;;  %v1375_v5 = vadd.f32 %v1374_v4, %v1373_v3  ;;  %v1376_v6 = vpop.f32.mrb[2].mxu0 }
 0x15c   : > { %v1401_v1 = vpop.f32.mrb[3].mxu1  ;;  %v1377_v7 = vpop.f32.mrb[3].mxu0 }
 0x15d   : > { %v2142_v2 = vadd.f32 %v1401_v1, %v1400_v0  ;;  %v1378_v9 = vadd.f32 %v1377_v7, %v1376_v6  ;;  %v656_v39 = vadd.f32 %v1375_v5, %v2155_v37 }
 0x15f   : > { %v659_v46 = vadd.f32 %v1378_v9, %v2155_v37 }
 0x161   : > { %v1403_v8 = vpop.f32.mrb[4].mxu1  ;;  %v1379_v15 = vpop.f32.mrb[4].mxu0 }
 0x162   : > { %v1404_v10 = vpop.f32.mrb[5].mxu1  ;;  %v1380_v16 = vpop.f32.mrb[5].mxu0 }
 0x163   : > { %v2144_v11 = vadd.f32 %v1404_v10, %v1403_v8  ;;  %v1406_v12 = vpop.f32.mrb[6].mxu1  ;;  %v1381_v17 = vadd.f32 %v1380_v16, %v1379_v15  ;;  %v1382_v18 = vpop.f32.mrb[6].mxu0 }
 0x164   : > { %v1407_v13 = vpop.f32.mrb[7].mxu1  ;;  %v1383_v19 = vpop.f32.mrb[7].mxu0 }
 0x165   : > { %v2146_v14 = vadd.f32 %v1407_v13, %v1406_v12  ;;  %v1384_v21 = vadd.f32 %v1383_v19, %v1382_v18  ;;  %v664_v52 = vadd.f32 %v1381_v17, %v2155_v37 }
 0x167   : > { %v667_v60 = vadd.f32 %v1384_v21, %v2155_v37 }
 0x169   : > { %v1409_v20 = vpop.f32.mrb[8].mxu1  ;;  %v1385_v27 = vpop.f32.mrb[8].mxu0 }
 0x16a   : > { %v1410_v22 = vpop.f32.mrb[9].mxu1  ;;  %v1386_v28 = vpop.f32.mrb[9].mxu0 }
 0x16b   : > { %v2148_v23 = vadd.f32 %v1410_v22, %v1409_v20  ;;  %v1412_v24 = vpop.f32.mrb[10].mxu1  ;;  %v1387_v29 = vadd.f32 %v1386_v28, %v1385_v27  ;;  %v1388_v30 = vpop.f32.mrb[10].mxu0 }
 0x16c   : > { %v1413_v25 = vpop.f32.mrb[11].mxu1  ;;  %v1389_v31 = vpop.f32.mrb[11].mxu0 }
 0x16d   : > { %v2150_v26 = vadd.f32 %v1413_v25, %v1412_v24  ;;  %v1390_v32 = vadd.f32 %v1389_v31, %v1388_v30  ;;  %v672_v4 = vadd.f32 %v1387_v29, %v2155_v37 }
 0x16f   : > { %v675_v12 = vadd.f32 %v1390_v32, %v2155_v37 }
 0x171   : > { %v1391_v33 = vpop.f32.mrb[12].mxu0 }
 0x172   : > { %v1392_v34 = vpop.f32.mrb[13].mxu0 }
 0x173   : > { %v1393_v35 = vadd.f32 %v1392_v34, %v1391_v33  ;;  %v1394_v36 = vpop.f32.mrb[14].mxu0 }
 0x174   : > { %v1395_v38 = vpop.f32.mrb[15].mxu0 }
 0x175   : > { %v1396_v41 = vadd.f32 %v1395_v38, %v1394_v36  ;;  %v680_v19 = vadd.f32 %v1393_v35, %v2155_v37  ;;  %v688_v35 = vadd.f32 %v2140_v63, %v2155_v37  ;;  %v696_v63 = vadd.f32 %v2144_v11, %v2155_v37 }
 0x176   : > { %v704_v11 = vadd.f32 %v2148_v23, %v2155_v37  ;;  %v1331_v23 = vld [vmem:[%s2321_s4] ss:$0 sm:$0xff] }
 0x177   : > { %v683_v28 = vadd.f32 %v1396_v41, %v2155_v37  ;;  %v691_v41 = vadd.f32 %v2142_v2, %v2155_v37  ;;  %v699_v2 = vadd.f32 %v2146_v14, %v2155_v37  ;;  %v707_v14 = vadd.f32 %v2150_v26, %v2155_v37 }
 0x179   : > { %v1431_v40 = vpop.f32.mrb[12].mxu1 }
 0x17a   : > { %v1432_v42 = vpop.f32.mrb[13].mxu1 }
 0x17b   : > { %v1433_v43 = vadd.f32 %v1432_v42, %v1431_v40  ;;  %v1434_v44 = vpop.f32.mrb[14].mxu1 }
 0x17c   : > { %v1435_v45 = vpop.f32.mrb[15].mxu1 }
 0x17d   : > { %v745_v47 = vadd.f32 %v1433_v43, %v656_v39  ;;  %v1436_v48 = vadd.f32 %v1435_v45, %v1434_v44 }
 0x17f   : > { %v748_v49 = vadd.f32 %v1436_v48, %v659_v46  ;;  %v799_v50 = vmax.f32 %v745_v47, 0.0 }
 0x181   : > { %v800_v51 = vmax.f32 %v748_v49, 0.0  ;;  %v1437_v54 = vpop.f32.mrb[16].mxu1 }
 0x182   : > { %v1438_v55 = vpop.f32.mrb[17].mxu1 }
 0x183   : > { %v813_v56 = vpack.c.bf16 %v800_v51, %v799_v50  ;;  %v1439_v57 = vadd.f32 %v1438_v55, %v1437_v54  ;;  %v1440_v58 = vpop.f32.mrb[18].mxu1 }
 0x184   : > { %v1441_v59 = vpop.f32.mrb[19].mxu1 }
 0x185   : > { %v753_v61 = vadd.f32 %v1439_v57, %v664_v52  ;;  %v1442_v62 = vadd.f32 %v1441_v59, %v1440_v58  ;;  %1505 = vmatmul.mubr.bf16.vlgmr.msra.gmra.mrb[16].mxu0 %v813_v56 }
 0x186   : > { %1508 = vmatprep.mubr.msk.bf16.mxu0 %vm1877_vm0, %v1876_v53 }
 0x187   : > { %v756_v0 = vadd.f32 %v1442_v62, %v667_v60  ;;  %v801_v1 = vmax.f32 %v753_v61, 0.0 }
 0x189   : > { %v802_v3 = vmax.f32 %v756_v0, 0.0  ;;  %v1443_v5 = vpop.f32.mrb[20].mxu1 }
 0x18a   : > { %v1444_v6 = vpop.f32.mrb[21].mxu1 }
 0x18b   : > { %v1445_v7 = vadd.f32 %v1444_v6, %v1443_v5  ;;  %v1446_v8 = vpop.f32.mrb[22].mxu1  ;;  %v814_v9 = vpack.c.bf16 %v802_v3, %v801_v1 }
 0x18c   : > { %v1447_v10 = vpop.f32.mrb[23].mxu1 }
 0x18d   : > { %v761_v13 = vadd.f32 %v1445_v7, %v672_v4  ;;  %v1448_v15 = vadd.f32 %v1447_v10, %v1446_v8  ;;  %1509 = vmatmul.mubr.bf16.gmra.mrb[20].mxu0 %v814_v9 }
 0x18e   : > { %1512 = vmatprep.mubr.msk.bf16.mxu0 %vm1877_vm0, %v1876_v53 }
 0x18f   : > { %v764_v16 = vadd.f32 %v1448_v15, %v675_v12  ;;  %v803_v17 = vmax.f32 %v761_v13, 0.0 }
 0x191   : > { %v804_v18 = vmax.f32 %v764_v16, 0.0  ;;  %v1449_v20 = vpop.f32.mrb[24].mxu1 }
 0x192   : > { %v1450_v21 = vpop.f32.mrb[25].mxu1 }
 0x193   : > { %v1451_v22 = vadd.f32 %v1450_v21, %v1449_v20  ;;  %v1452_v24 = vpop.f32.mrb[26].mxu1  ;;  %v815_v25 = vpack.c.bf16 %v804_v18, %v803_v17 }
 0x194   : > { %v1453_v27 = vpop.f32.mrb[27].mxu1 }
 0x195   : > { %v769_v29 = vadd.f32 %v1451_v22, %v680_v19  ;;  %v1454_v30 = vadd.f32 %v1453_v27, %v1452_v24  ;;  %1513 = vmatmul.mubr.bf16.gmra.mrb[24].mxu0 %v815_v25 }
 0x196   : > { %1516 = vmatprep.mubr.msk.bf16.mxu0 %vm1877_vm0, %v1876_v53 }
 0x197   : > { %v772_v31 = vadd.f32 %v1454_v30, %v683_v28  ;;  %v805_v32 = vmax.f32 %v769_v29, 0.0 }
 0x199   : > { %v806_v33 = vmax.f32 %v772_v31, 0.0  ;;  %v1455_v34 = vpop.f32.mrb[28].mxu1 }
 0x19a   : > { %v1456_v36 = vpop.f32.mrb[29].mxu1 }
 0x19b   : > { %v1457_v38 = vadd.f32 %v1456_v36, %v1455_v34  ;;  %v1458_v39 = vpop.f32.mrb[30].mxu1  ;;  %v816_v40 = vpack.c.bf16 %v806_v33, %v805_v32 }
 0x19c   : > { %v1459_v42 = vpop.f32.mrb[31].mxu1 }
 0x19d   : > { %v777_v43 = vadd.f32 %v1457_v38, %v688_v35  ;;  %v1460_v44 = vadd.f32 %v1459_v42, %v1458_v39  ;;  %1517 = vmatmul.mubr.bf16.gmra.mrb[28].mxu0 %v816_v40 }
 0x19e   : > { %1520 = vmatprep.mubr.msk.bf16.mxu0 %vm1877_vm0, %v1876_v53 }
 0x19f   : > { %v780_v45 = vadd.f32 %v1460_v44, %v691_v41  ;;  %v807_v46 = vmax.f32 %v777_v43, 0.0 }
 0x1a1   : > { %v808_v47 = vmax.f32 %v780_v45, 0.0  ;;  %v1461_v48 = vpop.f32.mrb[32].mxu1 }
 0x1a2   : > { %v1462_v49 = vpop.f32.mrb[33].mxu1 }
 0x1a3   : > { %v1463_v50 = vadd.f32 %v1462_v49, %v1461_v48  ;;  %v1464_v51 = vpop.f32.mrb[34].mxu1  ;;  %v817_v52 = vpack.c.bf16 %v808_v47, %v807_v46 }
 0x1a4   : > { %v1465_v54 = vpop.f32.mrb[35].mxu1 }
 0x1a5   : > { %v785_v55 = vadd.f32 %v1463_v50, %v696_v63  ;;  %v1466_v56 = vadd.f32 %v1465_v54, %v1464_v51  ;;  %1521 = vmatmul.mubr.bf16.gmra.mrb[32].mxu0 %v817_v52 }
 0x1a6   : > { %1524 = vmatprep.mubr.msk.bf16.mxu0 %vm1877_vm0, %v1876_v53 }
 0x1a7   : > { %v788_v57 = vadd.f32 %v1466_v56, %v699_v2  ;;  %v809_v58 = vmax.f32 %v785_v55, 0.0 }
 0x1a9   : > { %v810_v59 = vmax.f32 %v788_v57, 0.0  ;;  %v1467_v60 = vpop.f32.mrb[36].mxu1 }
 0x1aa   : > { %v1468_v61 = vpop.f32.mrb[37].mxu1 }
 0x1ab   : > { %v1469_v62 = vadd.f32 %v1468_v61, %v1467_v60  ;;  %v1470_v0 = vpop.f32.mrb[38].mxu1  ;;  %v818_v1 = vpack.c.bf16 %v810_v59, %v809_v58 }
 0x1ac   : > { %v1471_v3 = vpop.f32.mrb[39].mxu1 }
 0x1ad   : > { %v793_v4 = vadd.f32 %v1469_v62, %v704_v11  ;;  %v1472_v5 = vadd.f32 %v1471_v3, %v1470_v0  ;;  %1525 = vmatmul.mubr.bf16.gmra.mrb[36].mxu0 %v818_v1 }
 0x1ae   : > { %1528 = vmatprep.mubr.msk.bf16.mxu0 %vm1877_vm0, %v1876_v53 }
 0x1af   : > { %v796_v6 = vadd.f32 %v1472_v5, %v707_v14  ;;  %v811_v7 = vmax.f32 %v793_v4, 0.0 }
 0x1b1   : > { %v812_v8 = vmax.f32 %v796_v6, 0.0 }
 0x1b3   : > { %v819_v9 = vpack.c.bf16 %v812_v8, %v811_v7 }
 0x1b5   : > { %1529 = vmatmul.mubr.bf16.gmra.mrb[40].mxu0 %v819_v9 }
 0x258   : > { %v925_v10 = vpop.f32.mrb[16].mxu0 }
 0x259   : > { %v926_v12 = vadd.f32 %v1331_v23, %v925_v10  ;;  %v1506_v26 = vpop.f32.mrb[17].mxu0 }
 0x25a   : > { %v928_v37 = vpop.f32.mrb[18].mxu0 }
 0x25b   : > { %981 = vst.msk [vmem:[%s2193_s13] sm:$0xff] %vm980_vm1, %v926_v12  ;;  %v929_v53 = vadd.f32 %v1331_v23, %v928_v37  ;;  %v1507_v13 = vpop.f32.mrb[19].mxu0 }
 0x25d   : > { %982 = vst.msk [vmem:[%s2193_s13 + $0x8] sm:$0xff] %vm980_vm1, %v929_v53 }
 0x260   : > { %v933_v15 = vpop.f32.mrb[20].mxu0 }
 0x261   : > { %v934_v16 = vadd.f32 %v1331_v23, %v933_v15  ;;  %v1510_v17 = vpop.f32.mrb[21].mxu0 }
 0x262   : > { %v936_v18 = vpop.f32.mrb[22].mxu0 }
 0x263   : > { %983 = vst.msk [vmem:[%s2193_s13 + $0x10] sm:$0xff] %vm980_vm1, %v934_v16  ;;  %v937_v19 = vadd.f32 %v1331_v23, %v936_v18  ;;  %v1511_v20 = vpop.f32.mrb[23].mxu0 }
 0x265   : > { %984 = vst.msk [vmem:[%s2193_s13 + $0x18] sm:$0xff] %vm980_vm1, %v937_v19 }
 0x268   : > { %v941_v21 = vpop.f32.mrb[24].mxu0 }
 0x269   : > { %v942_v22 = vadd.f32 %v1331_v23, %v941_v21  ;;  %v1514_v24 = vpop.f32.mrb[25].mxu0 }
 0x26a   : > { %v944_v25 = vpop.f32.mrb[26].mxu0 }
 0x26b   : > { %985 = vst.msk [vmem:[%s2193_s13 + $0x20] sm:$0xff] %vm980_vm1, %v942_v22  ;;  %v945_v27 = vadd.f32 %v1331_v23, %v944_v25  ;;  %v1515_v28 = vpop.f32.mrb[27].mxu0 }
 0x26d   : > { %986 = vst.msk [vmem:[%s2193_s13 + $0x28] sm:$0xff] %vm980_vm1, %v945_v27 }
 0x270   : > { %v949_v29 = vpop.f32.mrb[28].mxu0 }
 0x271   : > { %v950_v30 = vadd.f32 %v1331_v23, %v949_v29  ;;  %v1518_v31 = vpop.f32.mrb[29].mxu0 }
 0x272   : > { %v952_v32 = vpop.f32.mrb[30].mxu0 }
 0x273   : > { %987 = vst.msk [vmem:[%s2193_s13 + $0x30] sm:$0xff] %vm980_vm1, %v950_v30  ;;  %v953_v33 = vadd.f32 %v1331_v23, %v952_v32  ;;  %v1519_v34 = vpop.f32.mrb[31].mxu0 }
 0x275   : > { %988 = vst.msk [vmem:[%s2193_s13 + $0x38] sm:$0xff] %vm980_vm1, %v953_v33 }
 0x278   : > { %v957_v36 = vpop.f32.mrb[32].mxu0 }
 0x279   : > { %v958_v35 = vadd.f32 %v1331_v23, %v957_v36  ;;  %v1522_v38 = vpop.f32.mrb[33].mxu0 }
 0x27a   : > { %v960_v39 = vpop.f32.mrb[34].mxu0 }
 0x27b   : > { %989 = vst.msk [vmem:[%s2193_s13 + $0x40] sm:$0xff] %vm980_vm1, %v958_v35  ;;  %v961_v40 = vadd.f32 %v1331_v23, %v960_v39  ;;  %v1523_v42 = vpop.f32.mrb[35].mxu0 }
 0x27d   : > { %990 = vst.msk [vmem:[%s2193_s13 + $0x48] sm:$0xff] %vm980_vm1, %v961_v40 }
 0x280   : > { %v965_v41 = vpop.f32.mrb[36].mxu0 }
 0x281   : > { %v966_v43 = vadd.f32 %v1331_v23, %v965_v41  ;;  %v1526_v44 = vpop.f32.mrb[37].mxu0 }
 0x282   : > { %v968_v45 = vpop.f32.mrb[38].mxu0 }
 0x283   : > { %991 = vst.msk [vmem:[%s2193_s13 + $0x50] sm:$0xff] %vm980_vm1, %v966_v43  ;;  %v969_v46 = vadd.f32 %v1331_v23, %v968_v45  ;;  %v1527_v47 = vpop.f32.mrb[39].mxu0 }
 0x285   : > { %992 = vst.msk [vmem:[%s2193_s13 + $0x58] sm:$0xff] %vm980_vm1, %v969_v46 }
 0x287   : > { %1001 = sbr.rel (!%p2336_p6) target bundleno = 715 (0x2cb), region = 52 }
 0x288   : > { %v973_v48 = vpop.f32.mrb[40].mxu0 }
 0x289   : > { %v974_v49 = vadd.f32 %v1331_v23, %v973_v48  ;;  %v1530_v63 = vpop.f32.mrb[41].mxu0 }
 0x28a   : > { %v976_v50 = vpop.f32.mrb[42].mxu0 }
 0x28b   : > { %993 = vst.msk [vmem:[%s2193_s13 + $0x60] sm:$0xff] %vm980_vm1, %v974_v49  ;;  %v977_v51 = vadd.f32 %v1331_v23, %v976_v50  ;;  %v1531_v52 = vpop.f32.mrb[43].mxu0 }
 0x28d   : > { %994 = vst.msk [vmem:[%s2193_s13 + $0x68] sm:$0xff] %vm980_vm1, %v977_v51 }
 0x28e   : > { %s2347_s17 = smov (!%p1004_p7, %s1003_s17), 14 }
 0x28f   : > { %s1340_s10 = sshll.u32 %s2347_s17, 7 }
 0x290   : > { %p1343_p9 = scmp.eq.s32.totalorder %s1340_s10, 0 }
 0x291   : > { %1706 = sdivrem.u32 (!%p1343_p9), %s2347_s17, 14 }
 0x292   : > { %1012 = sbr.rel (%p1343_p9) target bundleno = 715 (0x2cb), region = 56 }
 0x29a   : > { %s2236_s29 = spop.drf %1706 }
 0x29b   : > { %p1344_p12 = scmp.le.s32.totalorder %s2236_s29, 0 }
 0x29c   : > { %s2337_s22 = smov (!%p1344_p12), %s2230_s9  ;;  %s2338_s11 = smov (!%p1344_p12), %s2193_s13 }
 0x29d   : > { %1229 = sbr.rel (%p1344_p12) target bundleno = 686 (0x2ae), region = 138  ;;  %s2245_s8 = smov (!%p1344_p12), 0  }
 0x29e   : > { %s2247_s7 = smov (!%p1344_p12), 0  }
 0x2a4 LB: >> { %v1102_v54 = vld [vmem:[%s1844_s11] sm:$0xff]  ;;  %v1104_v2 = vld [vmem:[%s1844_s11 + $0x8] sm:$0xff]  ;;  %v1106_v55 = vld [vmem:[%s1844_s11 + $0x10] sm:$0xff]  ;;  %s1130_s27 = sadd.s32 1, %s1848_s8  ;;  %s1096_s7 = sadd.s32 1, %s1852_s7   ;;  %s1852_s7 = sphi %s2247_s7, %s1096_s7   ;;  %s1848_s8 = sphi %s2245_s8, %s2339_s8   ;;  %s1844_s11 = sphi %s2338_s11, %s1135_s11   ;;  %s1840_s22 = sphi %s2337_s22, %s1136_s22  }
 0x2a5   : >> { %1103 = vst [vmem:[%s1840_s22] sm:$0xff] %v1102_v54  ;;  %1105 = vst [vmem:[%s1840_s22 + $0x8] sm:$0xff] %v1104_v2  ;;  %v1108_v56 = vld [vmem:[%s1844_s11 + $0x18] sm:$0xff]  ;;  %v1110_v57 = vld [vmem:[%s1844_s11 + $0x20] sm:$0xff]  ;;  %p1131_p0 = scmp.ge.s32.totalorder %s1130_s27, %s2236_s29  ;;  %p1095_p2 = scmp.ge.s32.totalorder %s1096_s7, %s2236_s29 }
 0x2a6   : >> { %1107 = vst [vmem:[%s1840_s22 + $0x10] sm:$0xff] %v1106_v55  ;;  %v1112_v58 = vld [vmem:[%s1844_s11 + $0x28] sm:$0xff]  ;;  %1109 = vst [vmem:[%s1840_s22 + $0x18] sm:$0xff] %v1108_v56  ;;  %v1114_v59 = vld [vmem:[%s1844_s11 + $0x30] sm:$0xff] }
 0x2a7   : >> { %1111 = vst [vmem:[%s1840_s22 + $0x20] sm:$0xff] %v1110_v57  ;;  %1113 = vst [vmem:[%s1840_s22 + $0x28] sm:$0xff] %v1112_v58  ;;  %v1116_v60 = vld [vmem:[%s1844_s11 + $0x38] sm:$0xff]  ;;  %v1118_v61 = vld [vmem:[%s1844_s11 + $0x40] sm:$0xff]  ;;  %s2349_s27 = smov (%p1131_p0, %s1130_s27), 0  ;;  %1098 = sbr.rel (!%p1095_p2) target bundleno = 676 (0x2a4), region = 144 }
 0x2a8   : >> { %1115 = vst [vmem:[%s1840_s22 + $0x30] sm:$0xff] %v1114_v59  ;;  %1117 = vst [vmem:[%s1840_s22 + $0x38] sm:$0xff] %v1116_v60  ;;  %v1120_v11 = vld [vmem:[%s1844_s11 + $0x48] sm:$0xff]  ;;  %v1122_v62 = vld [vmem:[%s1844_s11 + $0x50] sm:$0xff]  ;;  %s1133_s15 = smul.u32 112, %s2349_s27  ;;  %s2339_s8 = smov %s2349_s27 }
 0x2a9   : >> { %1119 = vst [vmem:[%s1840_s22 + $0x40] sm:$0xff] %v1118_v61  ;;  %v1124_v0 = vld [vmem:[%s1844_s11 + $0x58] sm:$0xff]  ;;  %1121 = vst [vmem:[%s1840_s22 + $0x48] sm:$0xff] %v1120_v11  ;;  %v1126_v1 = vld [vmem:[%s1844_s11 + $0x60] sm:$0xff] }
 0x2aa   : >> { %1123 = vst [vmem:[%s1840_s22 + $0x50] sm:$0xff] %v1122_v62  ;;  %1125 = vst [vmem:[%s1840_s22 + $0x58] sm:$0xff] %v1124_v0  ;;  %v1128_v3 = vld [vmem:[%s1844_s11 + $0x68] sm:$0xff]  ;;  %s1135_s11 = scalar_lea.vmem %s2193_s13, %s1133_s15 [#allocation6]  }
 0x2ab   : >> { %1127 = vst [vmem:[%s1840_s22 + $0x60] sm:$0xff] %v1126_v1  ;;  %1129 = vst [vmem:[%s1840_s22 + $0x68] sm:$0xff] %v1128_v3  ;;  %s1136_s22 = scalar_lea.vmem %s2230_s9, %s1133_s15  }
 0x2ae PF: > { %1708 = sdivrem.u32 %s2347_s17, 14 }
 0x2af   : > { %s1345_s18 = smul.u32 112, %s2236_s29 }
 0x2b1   : > { %s1141_s24 = scalar_lea.vmem %s2193_s13, %s1345_s18 [#allocation6]   ;;  %s1143_s25 = scalar_lea.vmem %s2230_s9, %s1345_s18  }
 0x2b7   : > { %s1709_s28 = spop.drf %1708 }
 0x2b8   : > { %p1347_p4 = scmp.le.s32.totalorder %s1709_s28, 0 }
 0x2b9   : > { %s1854_s30 = smov (!%p1347_p4), %s1143_s25   ;;  %s1858_s12 = smov (!%p1347_p4), %s1141_s24  }
 0x2ba   : > { %1243 = sbr.rel (%p1347_p4) target bundleno = 715 (0x2cb), region = 149  ;;  %s1862_s16 = smov (!%p1347_p4), 0  }
 0x2bb   : > { %s1866_s14 = smov (!%p1347_p4), 0  }
 0x2c1 LB: >> { %v1153_v14 = vld [vmem:[%s1860_s12] sm:$0xff]  ;;  %s1155_s21 = sadd.s32 1, %s1864_s16  ;;  %s1147_s14 = sadd.s32 1, %s1868_s14   ;;  %s1868_s14 = sphi %s1866_s14, %s1147_s14   ;;  %s1864_s16 = sphi %s1862_s16, %s1863_s16   ;;  %s1860_s12 = sphi %s1858_s12, %s1160_s12   ;;  %s1856_s30 = sphi %s1854_s30, %s1161_s30  }
 0x2c2   : >> { %1154 = vst [vmem:[%s1856_s30] sm:$0xff] %v1153_v14  ;;  %p1156_p8 = scmp.ge.s32.totalorder %s1155_s21, %s1709_s28  ;;  %p1146_p10 = scmp.ge.s32.totalorder %s1147_s14, %s1709_s28 }
 0x2c4   : >> { %s2351_s21 = smov (%p1156_p8, %s1155_s21), 0  ;;  %1149 = sbr.rel (!%p1146_p10) target bundleno = 705 (0x2c1), region = 155 }
 0x2c5   : >> { %s1348_s13 = sshll.u32 %s2351_s21, 3  ;;  %s1863_s16 = smov %s2351_s21  }
 0x2c6   : >> { %s1160_s12 = scalar_lea.vmem %s1141_s24, %s1348_s13 [#allocation6]   ;;  %s1161_s30 = scalar_lea.vmem %s1143_s25, %s1348_s13  }
 0x2cb PF: > { %p16_p13 = scmp.ge.s32.totalorder %s1930_s23, 4   ;;  %s2340_s18 = smov %s1828_s19 }
 0x2cc   : > { %s2341_s19 = smov %s1832_s20  ;;  %s2342_s20 = smov %s1940_s26 }
 0x2cd   : > { %s2343_s21 = smov %s1930_s23  ;;  %18 = sbr.rel (!%p16_p13) target bundleno = 4 (0x4), region = 166 }
 0x2d4   :  { %1177 = vsyncpa [#allocation3], 1 }
 0x2d5   :  { %1179 = vsyncpa [#allocation3 + $0x1], 1 }
 0x2d6   :  { %1180 = vsyncpa [#allocation5], 1 }

</bundles_post_ra>
